<compile_context>
chip_gen: v6e
topology: v6e:2x2x1
jax: 0.10.0
libtpu: 0.0.40
codegen_flags: <defaults>
</compile_context>

<pallas_src>
import jax
import jax.numpy as jnp
from jax.experimental import pallas as pl
from jax.experimental.pallas import tpu as pltpu


def _attn_concat_kernel(dec_ref, enc_ref, wd_ref, we_ref, b_ref, out_ref):
    L, BN, H = enc_ref.shape                       # block shapes (static ints)

    dec_t = dec_ref[...]                           # (H, BN)  decoder, batch on lanes
    enc = enc_ref[...]                             # (L, BN, H)  native encoder layout
    wd = wd_ref[...]                               # (H, H)  decoder half of concat weight
    we = we_ref[...]                               # (H, H)  encoder half of concat weight
    bias = b_ref[...]                              # (H, 1)  f32

    # Decoder projection with the bias folded in once per block:
    #   (H, H) @ (H, BN) -> (H, BN), f32 accumulation, batch stays on lanes.
    dec_pb = jnp.dot(wd, dec_t, preferred_element_type=jnp.float32) + bias       # (H, BN)
    dec_f = dec_t.astype(jnp.float32)                                            # (H, BN)

    # Encoder projection with batch landing on the lane axis:
    #   We (H, K) contracted with enc (L*BN, K) over K -> (H, L*BN)
    # ("A @ B^T" MXU pattern: no explicit transpose / relayout of the big operand).
    enc2 = enc.reshape(L * BN, H)                  # free merge of leading dims (BN % 8 == 0)
    enc_proj = jax.lax.dot_general(
        we, enc2, (((1,), (1,)), ((), ())),
        preferred_element_type=jnp.float32,
    )                                              # (H, L*BN)  f32, lane-dense

    # Per-l (static unroll over the small L):
    #   energy_l = tanh(dec@Wd^T + b + enc_l@We^T)          (H, BN), fully lane-dense
    #   score_l  = sum_h dec[h, n] * energy_l[h, n]          (1, BN)
    # Slices are lane-vreg aligned (BN is a multiple of 128), dec_pb / dec_f stay in vregs.
    cols = []
    for l in range(L):
        enc_proj_l = enc_proj[:, l * BN:(l + 1) * BN]                             # (H, BN)
        energy_l = jnp.tanh(dec_pb + enc_proj_l)                                  # (H, BN)
        cols.append(jnp.sum(dec_f * energy_l, axis=0, keepdims=True))             # (1, BN)
    score = jnp.concatenate(cols, axis=0)                                         # (L, BN)

    # Numerically-stable softmax over L per batch lane (== torch.softmax(score.t(), dim=1)).
    m = jnp.max(score, axis=0, keepdims=True)                                     # (1, BN)
    e = jnp.exp(score - m)                                                        # (L, BN)
    denom = jnp.sum(e, axis=0, keepdims=True)                                     # (1, BN)

    out_ref[...] = (e / denom).astype(out_ref.dtype)                              # (L, BN)


def attn_layer_concat(decoder_output, encoder_state, w_attn, b_attn,
                      *, block_n=256, input_dtype=None):
    """Luong 'concat' attention forward.

    decoder_output: (1, N, H); encoder_state: (L, N, H) (native layout, never transposed);
    w_attn: (H, 2H) = nn.Linear(2H, H).weight; b_attn: (H,).
    block_n: batch rows per grid step (rounded to a multiple of 128).
    input_dtype: optional cast (e.g. jnp.bfloat16) for the streamed tensors -- halves HBM
                 traffic on HBM-bound parts (v5e); accumulation/tanh/softmax stay f32.
    Returns attention weights of shape (N, 1, L), float32.
    """
    _, N, H = decoder_output.shape
    L = encoder_state.shape[0]

    # ---- batch-block selection: lane-dense blocks (multiples of 128) -------------------
    groups_cap = max(1, block_n // 128)
    n128 = pl.cdiv(N, 128)
    if n128 <= 1:
        groups = 1
    else:
        # Keep at least 2 grid steps so the batch axis shards across v7x's two TensorCores.
        groups = min(groups_cap, (n128 + 1) // 2)

    # Keep the (double-buffered) encoder block plus f32 temporaries well inside scoped VMEM
    # (v7x: 64 MiB physical / 32 MiB scoped default).
    esize = jnp.dtype(input_dtype if input_dtype is not None else encoder_state.dtype).itemsize

    def _step_bytes(g):
        bn = 128 * g
        return L * bn * H * (2 * esize + 4 * 4)   # 2x input double-buffer + ~4 f32 temps

    while groups > 1 and _step_bytes(groups) > (16 << 20):
        groups -= 1

    BN = 128 * groups
    grid_n = pl.cdiv(N, BN)
    n_pad = BN * grid_n

    # ---- wrapper-side layout plumbing (only tiny tensors are transposed) ---------------
    dec_t = decoder_output.reshape(N, H).T                  # (H, N)  -- tiny
    wd = w_attn[:, :H]                                      # (H, H): decoder half
    we = w_attn[:, H:]                                      # (H, H): encoder half
    bias = b_attn.reshape(H, 1).astype(jnp.float32)

    if input_dtype is not None:
        dec_t = dec_t.astype(input_dtype)
        encoder_state = encoder_state.astype(input_dtype)
        wd = wd.astype(input_dtype)
        we = we.astype(input_dtype)

    if n_pad != N:
        # Zero padding keeps the padded lanes finite (score 0 -> uniform softmax, dropped).
        dec_t = jnp.pad(dec_t, ((0, 0), (0, n_pad - N)))
        enc = jnp.pad(encoder_state, ((0, 0), (0, n_pad - N), (0, 0)))
    else:
        enc = encoder_state

    out2d = pl.pallas_call(
        _attn_concat_kernel,
        out_shape=jax.ShapeDtypeStruct((L, n_pad), jnp.float32),
        grid_spec=pltpu.PrefetchScalarGridSpec(
            num_scalar_prefetch=0,
            grid=(grid_n,),
            in_specs=[
                pl.BlockSpec((H, BN), lambda n: (0, n)),        # decoder, batch on lanes
                pl.BlockSpec((L, BN, H), lambda n: (0, n, 0)),  # encoder, NATIVE (L, N, H)
                pl.BlockSpec((H, H), lambda n: (0, 0)),         # Wd (grid-invariant)
                pl.BlockSpec((H, H), lambda n: (0, 0)),         # We (grid-invariant)
                pl.BlockSpec((H, 1), lambda n: (0, 0)),         # bias
            ],
            out_specs=pl.BlockSpec((L, BN), lambda n: (0, n)),  # lane-dense (BN >= 128) store
        ),
        compiler_params=pltpu.CompilerParams(
            dimension_semantics=("parallel",),
        ),
    )(dec_t, enc, wd, we, bias)

    # Tiny (L, N) -> (N, 1, L) transpose / unsqueeze outside the kernel.
    return out2d[:, :N].T[:, None, :]


def _reference(decoder_output, encoder_state, w_attn, b_attn):
    # Pure-JAX reference mirroring the PyTorch code path (with the intended broadcast).
    dec_exp = jnp.broadcast_to(decoder_output, encoder_state.shape)          # (L, N, H)
    cat = jnp.concatenate([dec_exp, encoder_state], axis=2)                  # (L, N, 2H)
    energy = jnp.tanh(
        jnp.einsum("lnk,hk->lnh", cat, w_attn,
                   precision=jax.lax.Precision.HIGHEST) + b_attn)            # (L, N, H)
    score = jnp.sum(decoder_output * energy, axis=2).T                       # (N, L)
    probs = jax.nn.softmax(score, axis=1)
    return probs[:, None, :]                                                 # (N, 1, L)


if __name__ == "__main__":
    H = 32
    key = jax.random.PRNGKey(0)
    k_w, k_b = jax.random.split(key, 2)

    # Deterministic synthetic parameters (nn.Linear(2H, H): weight (H, 2H), bias (H,)).
    w_attn = jax.random.normal(k_w, (H, 2 * H), dtype=jnp.float32) * 0.1
    b_attn = jax.random.normal(k_b, (H,), dtype=jnp.float32) * 0.1

    # N=2: tiny batch, single padded block.  N=256: two 128-wide blocks (dual-TC friendly).
    # N=300: multi-block with a padded ragged tail.
    for N, L in [(2, 8), (256, 8), (300, 8)]:
        kd, ke = jax.random.split(jax.random.fold_in(key, N), 2)
        decoder_output = jax.random.normal(kd, (1, N, H), dtype=jnp.float32)
        encoder_state = jax.random.normal(ke, (L, N, H), dtype=jnp.float32)

        out = attn_layer_concat(decoder_output, encoder_state, w_attn, b_attn)
        out = jax.block_until_ready(out)

        ref = _reference(decoder_output, encoder_state, w_attn, b_attn)
        assert out.shape == (N, 1, L)
        assert jnp.allclose(out, ref, atol=1e-4, rtol=1e-4), f"mismatch vs reference at N={N}"

    # bf16-input path (HBM-bound v5e): f32 accumulation / tanh / softmax, looser tolerance.
    N, L = 256, 8
    kd, ke = jax.random.split(jax.random.fold_in(key, 9999), 2)
    decoder_output = jax.random.normal(kd, (1, N, H), dtype=jnp.float32)
    encoder_state = jax.random.normal(ke, (L, N, H), dtype=jnp.float32)
    out_bf16 = attn_layer_concat(decoder_output, encoder_state, w_attn, b_attn,
                                 input_dtype=jnp.bfloat16)
    out_bf16 = jax.block_until_ready(out_bf16)
    ref = _reference(decoder_output, encoder_state, w_attn, b_attn)
    assert out_bf16.shape == (N, 1, L)
    assert bool(jnp.all(jnp.isfinite(out_bf16)))
    assert jnp.allclose(out_bf16, ref, atol=5e-2, rtol=5e-2), "bf16-input path mismatch"

    print("KERNEL_OK")
</pallas_src>

<mosaic_0001>
module attributes {stable_mosaic.version = 11 : i64} {
  func.func @_attn_concat_kernel(%arg0: i32, %arg1: memref<32x128xf32, #tpu.memory_space<vmem>>, %arg2: memref<8x128x32xf32, #tpu.memory_space<vmem>>, %arg3: memref<32x32xf32, #tpu.memory_space<vmem>>, %arg4: memref<32x32xf32, #tpu.memory_space<vmem>>, %arg5: memref<32x1xf32, #tpu.memory_space<vmem>>, %arg6: memref<8x128xf32, #tpu.memory_space<vmem>>) attributes {dimension_semantics = [#tpu.dimension_semantics<parallel>], iteration_bounds = array<i64: 1>, scalar_prefetch = 0 : i64, scratch_operands = 0 : i64, tpu.core_type = #tpu.core_type<tc>, window_params = [{transform_indices = @transform_0, window_bounds = array<i64: 32, 128>}, {transform_indices = @transform_1, window_bounds = array<i64: 8, 128, 32>}, {pipeline_mode = #tpu.pipeline_mode<synchronous>, transform_indices = @transform_2, window_bounds = array<i64: 32, 32>}, {pipeline_mode = #tpu.pipeline_mode<synchronous>, transform_indices = @transform_3, window_bounds = array<i64: 32, 32>}, {pipeline_mode = #tpu.pipeline_mode<synchronous>, transform_indices = @transform_4, window_bounds = array<i64: 32, 1>}, {transform_indices = @transform_5, window_bounds = array<i64: 8, 128>}]} {
    %c0 = arith.constant 0 : index
    %c0_0 = arith.constant 0 : index
    %0 = vector.load %arg1[%c0, %c0_0] : memref<32x128xf32, #tpu.memory_space<vmem>>, vector<32x128xf32>
    %c0_1 = arith.constant 0 : index
    %c0_2 = arith.constant 0 : index
    %c0_3 = arith.constant 0 : index
    %1 = vector.load %arg2[%c0_1, %c0_2, %c0_3] : memref<8x128x32xf32, #tpu.memory_space<vmem>>, vector<8x128x32xf32>
    %c0_4 = arith.constant 0 : index
    %c0_5 = arith.constant 0 : index
    %2 = vector.load %arg3[%c0_4, %c0_5] : memref<32x32xf32, #tpu.memory_space<vmem>>, vector<32x32xf32>
    %c0_6 = arith.constant 0 : index
    %c0_7 = arith.constant 0 : index
    %3 = vector.load %arg4[%c0_6, %c0_7] : memref<32x32xf32, #tpu.memory_space<vmem>>, vector<32x32xf32>
    %c0_8 = arith.constant 0 : index
    %c0_9 = arith.constant 0 : index
    %4 = vector.load %arg5[%c0_8, %c0_9] : memref<32x1xf32, #tpu.memory_space<vmem>>, vector<32x1xf32>
    %cst = arith.constant dense<0.000000e+00> : vector<32x128xf32>
    %5 = tpu.matmul %2, %0, %cst {dimension_numbers = #tpu.dot_dimension_numbers<[1], [0], [0], [1], [0, 0, 1, 1], [], []>} : vector<32x32xf32>, vector<32x128xf32>, vector<32x128xf32> -> vector<32x128xf32>
    %6 = vector.broadcast %4 : vector<32x1xf32> to vector<32x128xf32>
    %7 = arith.addf %5, %6 : vector<32x128xf32>
    %8 = vector.shape_cast %1 : vector<8x128x32xf32> to vector<1024x32xf32>
    %cst_10 = arith.constant dense<0.000000e+00> : vector<32x1024xf32>
    %9 = tpu.matmul %3, %8, %cst_10 {dimension_numbers = #tpu.dot_dimension_numbers<[1], [1], [0], [0], [0, 0, 1, 0], [], []>} : vector<32x32xf32>, vector<1024x32xf32>, vector<32x1024xf32> -> vector<32x1024xf32>
    %10 = vector.extract_strided_slice %9 {offsets = [0, 0], sizes = [32, 128], strides = [1, 1]} : vector<32x1024xf32> to vector<32x128xf32>
    %11 = arith.addf %7, %10 : vector<32x128xf32>
    %12 = math.tanh %11 : vector<32x128xf32>
    %13 = arith.mulf %0, %12 : vector<32x128xf32>
    %cst_11 = arith.constant dense<0.000000e+00> : vector<128xf32>
    %14 = vector.multi_reduction <add>, %13, %cst_11 [0] : vector<32x128xf32> to vector<128xf32>
    %15 = vector.shape_cast %14 : vector<128xf32> to vector<1x128xf32>
    %16 = vector.extract_strided_slice %9 {offsets = [0, 128], sizes = [32, 128], strides = [1, 1]} : vector<32x1024xf32> to vector<32x128xf32>
    %17 = arith.addf %7, %16 : vector<32x128xf32>
    %18 = math.tanh %17 : vector<32x128xf32>
    %19 = arith.mulf %0, %18 : vector<32x128xf32>
    %cst_12 = arith.constant dense<0.000000e+00> : vector<128xf32>
    %20 = vector.multi_reduction <add>, %19, %cst_12 [0] : vector<32x128xf32> to vector<128xf32>
    %21 = vector.shape_cast %20 : vector<128xf32> to vector<1x128xf32>
    %22 = vector.extract_strided_slice %9 {offsets = [0, 256], sizes = [32, 128], strides = [1, 1]} : vector<32x1024xf32> to vector<32x128xf32>
    %23 = arith.addf %7, %22 : vector<32x128xf32>
    %24 = math.tanh %23 : vector<32x128xf32>
    %25 = arith.mulf %0, %24 : vector<32x128xf32>
    %cst_13 = arith.constant dense<0.000000e+00> : vector<128xf32>
    %26 = vector.multi_reduction <add>, %25, %cst_13 [0] : vector<32x128xf32> to vector<128xf32>
    %27 = vector.shape_cast %26 : vector<128xf32> to vector<1x128xf32>
    %28 = vector.extract_strided_slice %9 {offsets = [0, 384], sizes = [32, 128], strides = [1, 1]} : vector<32x1024xf32> to vector<32x128xf32>
    %29 = arith.addf %7, %28 : vector<32x128xf32>
    %30 = math.tanh %29 : vector<32x128xf32>
    %31 = arith.mulf %0, %30 : vector<32x128xf32>
    %cst_14 = arith.constant dense<0.000000e+00> : vector<128xf32>
    %32 = vector.multi_reduction <add>, %31, %cst_14 [0] : vector<32x128xf32> to vector<128xf32>
    %33 = vector.shape_cast %32 : vector<128xf32> to vector<1x128xf32>
    %34 = vector.extract_strided_slice %9 {offsets = [0, 512], sizes = [32, 128], strides = [1, 1]} : vector<32x1024xf32> to vector<32x128xf32>
    %35 = arith.addf %7, %34 : vector<32x128xf32>
    %36 = math.tanh %35 : vector<32x128xf32>
    %37 = arith.mulf %0, %36 : vector<32x128xf32>
    %cst_15 = arith.constant dense<0.000000e+00> : vector<128xf32>
    %38 = vector.multi_reduction <add>, %37, %cst_15 [0] : vector<32x128xf32> to vector<128xf32>
    %39 = vector.shape_cast %38 : vector<128xf32> to vector<1x128xf32>
    %40 = vector.extract_strided_slice %9 {offsets = [0, 640], sizes = [32, 128], strides = [1, 1]} : vector<32x1024xf32> to vector<32x128xf32>
    %41 = arith.addf %7, %40 : vector<32x128xf32>
    %42 = math.tanh %41 : vector<32x128xf32>
    %43 = arith.mulf %0, %42 : vector<32x128xf32>
    %cst_16 = arith.constant dense<0.000000e+00> : vector<128xf32>
    %44 = vector.multi_reduction <add>, %43, %cst_16 [0] : vector<32x128xf32> to vector<128xf32>
    %45 = vector.shape_cast %44 : vector<128xf32> to vector<1x128xf32>
    %46 = vector.extract_strided_slice %9 {offsets = [0, 768], sizes = [32, 128], strides = [1, 1]} : vector<32x1024xf32> to vector<32x128xf32>
    %47 = arith.addf %7, %46 : vector<32x128xf32>
    %48 = math.tanh %47 : vector<32x128xf32>
    %49 = arith.mulf %0, %48 : vector<32x128xf32>
    %cst_17 = arith.constant dense<0.000000e+00> : vector<128xf32>
    %50 = vector.multi_reduction <add>, %49, %cst_17 [0] : vector<32x128xf32> to vector<128xf32>
    %51 = vector.shape_cast %50 : vector<128xf32> to vector<1x128xf32>
    %52 = vector.extract_strided_slice %9 {offsets = [0, 896], sizes = [32, 128], strides = [1, 1]} : vector<32x1024xf32> to vector<32x128xf32>
    %53 = arith.addf %7, %52 : vector<32x128xf32>
    %54 = math.tanh %53 : vector<32x128xf32>
    %55 = arith.mulf %0, %54 : vector<32x128xf32>
    %cst_18 = arith.constant dense<0.000000e+00> : vector<128xf32>
    %56 = vector.multi_reduction <add>, %55, %cst_18 [0] : vector<32x128xf32> to vector<128xf32>
    %57 = vector.shape_cast %56 : vector<128xf32> to vector<1x128xf32>
    %58 = tpu.concatenate %15, %21, %27, %33, %39, %45, %51, %57 in 0 : vector<1x128xf32>, vector<1x128xf32>, vector<1x128xf32>, vector<1x128xf32>, vector<1x128xf32>, vector<1x128xf32>, vector<1x128xf32>, vector<1x128xf32> -> vector<8x128xf32>
    %cst_19 = arith.constant dense<0xFF800000> : vector<128xf32>
    %59 = vector.multi_reduction <maximumf>, %58, %cst_19 [0] : vector<8x128xf32> to vector<128xf32>
    %60 = vector.shape_cast %59 : vector<128xf32> to vector<1x128xf32>
    %61 = vector.broadcast %60 : vector<1x128xf32> to vector<8x128xf32>
    %62 = arith.subf %58, %61 : vector<8x128xf32>
    %63 = math.exp %62 : vector<8x128xf32>
    %cst_20 = arith.constant dense<0.000000e+00> : vector<128xf32>
    %64 = vector.multi_reduction <add>, %63, %cst_20 [0] : vector<8x128xf32> to vector<128xf32>
    %65 = vector.shape_cast %64 : vector<128xf32> to vector<1x128xf32>
    %66 = vector.broadcast %65 : vector<1x128xf32> to vector<8x128xf32>
    %67 = arith.divf %63, %66 : vector<8x128xf32>
    %c0_21 = arith.constant 0 : index
    %c0_22 = arith.constant 0 : index
    %68 = vector.load %arg6[%c0_21, %c0_22] : memref<8x128xf32, #tpu.memory_space<vmem>>, vector<8x128xf32>
    tpu.vector_store %arg6[%c0_21, %c0_22], %67 {strides = array<i32>} : memref<8x128xf32, #tpu.memory_space<vmem>>, vector<8x128xf32>,
    return
  }
  func.func @transform_0(%arg0: i32) -> (i32, i32) {
    %c0_i32 = arith.constant 0 : i32
    %c0_i32_0 = arith.constant 0 : i32
    return %c0_i32, %arg0 : i32, i32
  }
  func.func @transform_1(%arg0: i32) -> (i32, i32, i32) {
    %c0_i32 = arith.constant 0 : i32
    %c0_i32_0 = arith.constant 0 : i32
    %c0_i32_1 = arith.constant 0 : i32
    return %c0_i32, %arg0, %c0_i32_0 : i32, i32, i32
  }
  func.func @transform_2(%arg0: i32) -> (i32, i32) {
    %c0_i32 = arith.constant 0 : i32
    %c0_i32_0 = arith.constant 0 : i32
    %c0_i32_1 = arith.constant 0 : i32
    return %c0_i32, %c0_i32_0 : i32, i32
  }
  func.func @transform_3(%arg0: i32) -> (i32, i32) {
    %c0_i32 = arith.constant 0 : i32
    %c0_i32_0 = arith.constant 0 : i32
    %c0_i32_1 = arith.constant 0 : i32
    return %c0_i32, %c0_i32_0 : i32, i32
  }
  func.func @transform_4(%arg0: i32) -> (i32, i32) {
    %c0_i32 = arith.constant 0 : i32
    %c0_i32_0 = arith.constant 0 : i32
    %c0_i32_1 = arith.constant 0 : i32
    return %c0_i32, %c0_i32_0 : i32, i32
  }
  func.func @transform_5(%arg0: i32) -> (i32, i32) {
    %c0_i32 = arith.constant 0 : i32
    %c0_i32_0 = arith.constant 0 : i32
    return %c0_i32, %arg0 : i32, i32
  }
}

</mosaic_0001>

<bundles_post_ra>
// kernel: tpu_custom_call.1
= control target key start
LH: loop header
LB: loop body
LE: loop exit
PB: predicated region body
PF: predicated region fallthrough
CT: control target
= control target key end

     0   :  { %vm185_vm0 = vcmask 261120   ;;  %v1675_v10 = vmov 0   ;;  %s2435_s0 = inlined_call_operand.vmem [shape: f32[32,128], index: 0, kind: input, shape index: {}]   ;;  %s2436_s1 = inlined_call_operand.vmem [shape: f32[8,128,32], index: 1, kind: input, shape index: {}]   ;;  %s2437_s2 = inlined_call_operand.vmem [shape: f32[32,32], index: 2, kind: input, shape index: {}]   ;;  %s2438_s3 = inlined_call_operand.vmem [shape: f32[32,32], index: 3, kind: input, shape index: {}]   ;;  %s2439_s4 = inlined_call_operand.vmem [shape: f32[32,1], index: 4, kind: input, shape index: {}]   ;;  %s2440_s5 = inlined_call_operand.hbm [shape: f32[8,128], index: 5, kind: output, shape index: {}]  }
   0x1   :  { %v1710_v0 = vld [vmem:[%s2435_s0 + $0x18] sm:$0xff]  ;;  %v1723_v3 = vld [vmem:[%s2435_s0 + $0x10] sm:$0xff]  ;;  %v1733_v5 = vld [vmem:[%s2435_s0 + $0x8] sm:$0xff]  ;;  %1581 = vset.pattern.permute.xlu0 %v1675_v10  ;;  %1582 = vset.pattern.permute.xlu1 %v1675_v10 }
   0x2   :  { %v56_v1 = vld [vmem:[%s2436_s1 + $0xf8] sm:$0xff]  ;;  %1565 = vmatprep.subr.mxu0 %v1710_v0  ;;  %v55_v4 = vld [vmem:[%s2436_s1 + $0xf0] sm:$0xff]  ;;  %v153_v6 = vld [vmem:[%s2437_s2] sm:$0xff] }
   0x3   :  { %v40_v2 = vld [vmem:[%s2436_s1 + $0x78] sm:$0xff]  ;;  %1405 = vmatprep.subr.msk.mxu1 %vm185_vm0, %v56_v1  ;;  %1566 = vmatpush3.msra.mxu0 %v1710_v0  ;;  %v39_v7 = vld [vmem:[%s2436_s1 + $0x70] sm:$0xff]  ;;  %v1747_v8 = vld [vmem:[%s2435_s0] sm:$0xff] }
   0x4   :  { %1406 = vmatpush3.xpose.msk.msra.mxu1 %vm185_vm0, %v40_v2  ;;  %1567 = vmatprep.subr.mxu0 %v1723_v3  ;;  %v54_v9 = vld [vmem:[%s2436_s1 + $0xe8] sm:$0xff]  ;;  %v88_v12 = vld [vmem:[%s2436_s1 + $0x1f8] sm:$0xff]  ;;  %v53_v15 = vld [vmem:[%s2436_s1 + $0xe0] sm:$0xff] }
   0x5   :  { %1407 = vmatprep.subr.msk.mxu1 %vm185_vm0, %v55_v4  ;;  %1568 = vmatpush3.msra.mxu0 %v1723_v3  ;;  %v154_v11 = vld [vmem:[%s2437_s2 + $0x8] sm:$0xff]  ;;  %v72_v14 = vld [vmem:[%s2436_s1 + $0x178] sm:$0xff]  ;;  %v87_v16 = vld [vmem:[%s2436_s1 + $0x1f0] sm:$0xff] }
   0x6   :  { %1573 = vmatprep.mubr.msk.f32.mxu0 %vm185_vm0, %v153_v6  ;;  %1569 = vmatprep.subr.mxu0 %v1733_v5  ;;  %v38_v13 = vld [vmem:[%s2436_s1 + $0x68] sm:$0xff]  ;;  %v37_v17 = vld [vmem:[%s2436_s1 + $0x60] sm:$0xff]  ;;  %v71_v18 = vld [vmem:[%s2436_s1 + $0x170] sm:$0xff] }
   0x7   :  { %1570 = vmatpush3.msra.mxu0 %v1733_v5  ;;  %v52_v19 = vld [vmem:[%s2436_s1 + $0xd8] sm:$0xff]  ;;  %v86_v20 = vld [vmem:[%s2436_s1 + $0x1e8] sm:$0xff]  ;;  %v51_v23 = vld [vmem:[%s2436_s1 + $0xd0] sm:$0xff] }
   0x8   :  { %1408 = vmatpush3.xpose.msk.msra.mxu1 %vm185_vm0, %v39_v7  ;;  %1571 = vmatprep.subr.mxu0 %v1747_v8  ;;  %v36_v21 = vld [vmem:[%s2436_s1 + $0x58] sm:$0xff]  ;;  %v70_v22 = vld [vmem:[%s2436_s1 + $0x168] sm:$0xff]  ;;  %v85_v24 = vld [vmem:[%s2436_s1 + $0x1e0] sm:$0xff] }
   0x9   :  { %1409 = vmatprep.subr.msk.mxu1 %vm185_vm0, %v54_v9  ;;  %1572 = vmatpush3.msra.mxu0 %v1747_v8  ;;  %v35_v25 = vld [vmem:[%s2436_s1 + $0x50] sm:$0xff]  ;;  %v69_v26 = vld [vmem:[%s2436_s1 + $0x160] sm:$0xff]  ;;  %v50_v27 = vld [vmem:[%s2436_s1 + $0xc8] sm:$0xff] }
   0xa   :  { %1574 = vmatmul.mubr.msk.f32.vlgmr.msra.gmra.mxu0 %vm185_vm0, %v154_v11  ;;  %1445 = vmatprep.subr.msk.mxu0 %vm185_vm0, %v88_v12  ;;  %v84_v28 = vld [vmem:[%s2436_s1 + $0x1d8] sm:$0xff]  ;;  %v1832_v29 = vld [vmem:[%s2438_s3] sm:$0xff]  ;;  %v34_v30 = vld [vmem:[%s2436_s1 + $0x48] sm:$0xff] }
   0xb   :  { %1446 = vmatpush3.xpose.msk.msra.mxu0 %vm185_vm0, %v72_v14  ;;  %v68_v31 = vld [vmem:[%s2436_s1 + $0x158] sm:$0xff]  ;;  %v155_v32 = vld [vmem:[%s2437_s2 + $0x10] sm:$0xff]  ;;  %v49_v33 = vld [vmem:[%s2436_s1 + $0xc0] sm:$0xff]  ;;  %1437 = vmatprep.mubr.msk.f32.mxu1 %vm185_vm0, %v1832_v29 }
   0xc   :  { %1410 = vmatpush3.xpose.msk.msra.mxu1 %vm185_vm0, %v38_v13  ;;  %1447 = vmatprep.subr.msk.mxu0 %vm185_vm0, %v87_v16  ;;  %v83_v34 = vld [vmem:[%s2436_s1 + $0x1d0] sm:$0xff]  ;;  %v156_v35 = vld [vmem:[%s2437_s2 + $0x18] sm:$0xff]  ;;  %v33_v36 = vld [vmem:[%s2436_s1 + $0x40] sm:$0xff] }
   0xd   :  { %1411 = vmatprep.subr.msk.mxu1 %vm185_vm0, %v53_v15  ;;  %1576 = vmatprep.mubr.msk.f32.mxu0 %vm185_vm0, %v155_v32  ;;  %v67_v37 = vld [vmem:[%s2436_s1 + $0x150] sm:$0xff]  ;;  %v161_v38 = vld [vmem:[%s2439_s4] sm:$0xff]  ;;  %v48_v39 = vld [vmem:[%s2436_s1 + $0xb8] sm:$0xff] }
   0xe   :  { %1577 = vmatmul.mubr.msk.f32.gmra.mxu0 %vm185_vm0, %v156_v35  ;;  %v82_v40 = vld [vmem:[%s2436_s1 + $0x1c8] sm:$0xff]  ;;  %167 = vperm.xlu0 %1581, %v161_v38   ;;  %v32_v42 = vld [vmem:[%s2436_s1 + $0x38] sm:$0xff]  ;;  %v47_v44 = vld [vmem:[%s2436_s1 + $0xb0] sm:$0xff] }
   0xf   :  { %1448 = vmatpush3.xpose.msk.msra.mxu0 %vm185_vm0, %v71_v18  ;;  %1477 = vmatprep.mubr.msk.f32.mxu0 %vm185_vm0, %v1832_v29  ;;  %v162_v41 = vld [vmem:[%s2439_s4 + $0x8] sm:$0xff]  ;;  %v81_v45 = vld [vmem:[%s2436_s1 + $0x1c0] sm:$0xff]  ;;  %v31_v46 = vld [vmem:[%s2436_s1 + $0x30] sm:$0xff] }
  0x10   :  { %1412 = vmatpush3.xpose.msk.msra.mxu1 %vm185_vm0, %v37_v17  ;;  %1449 = vmatprep.subr.msk.mxu0 %vm185_vm0, %v86_v20  ;;  %v66_v43 = vld [vmem:[%s2436_s1 + $0x148] sm:$0xff]  ;;  %v65_v47 = vld [vmem:[%s2436_s1 + $0x140] sm:$0xff]  ;;  %v80_v49 = vld [vmem:[%s2436_s1 + $0x1b8] sm:$0xff] }
  0x11   :  { %1413 = vmatprep.subr.msk.mxu1 %vm185_vm0, %v52_v19  ;;  %v46_v48 = vld [vmem:[%s2436_s1 + $0xa8] sm:$0xff]  ;;  %v64_v51 = vld [vmem:[%s2436_s1 + $0x138] sm:$0xff]  ;;  %v45_v52 = vld [vmem:[%s2436_s1 + $0xa0] sm:$0xff] }
  0x12   :  { %172 = vperm.xlu0 %1581, %v162_v41   ;;  %v30_v50 = vld [vmem:[%s2436_s1 + $0x28] sm:$0xff]  ;;  %v79_v53 = vld [vmem:[%s2436_s1 + $0x1b0] sm:$0xff]  ;;  %v29_v54 = vld [vmem:[%s2436_s1 + $0x20] sm:$0xff] }
  0x13   :  { %1450 = vmatpush3.xpose.msk.msra.mxu0 %vm185_vm0, %v70_v22  ;;  %v63_v55 = vld [vmem:[%s2436_s1 + $0x130] sm:$0xff]  ;;  %v44_v56 = vld [vmem:[%s2436_s1 + $0x98] sm:$0xff]  ;;  %v78_v57 = vld [vmem:[%s2436_s1 + $0x1a8] sm:$0xff] }
  0x14   :  { %1414 = vmatpush3.xpose.msk.msra.mxu1 %vm185_vm0, %v36_v21  ;;  %1451 = vmatprep.subr.msk.mxu0 %vm185_vm0, %v85_v24  ;;  %v28_v58 = vld [vmem:[%s2436_s1 + $0x18] sm:$0xff]  ;;  %v62_v59 = vld [vmem:[%s2436_s1 + $0x128] sm:$0xff]  ;;  %v163_v60 = vld [vmem:[%s2439_s4 + $0x10] sm:$0xff] }
  0x15   :  { %1415 = vmatprep.subr.msk.mxu1 %vm185_vm0, %v51_v23  ;;  %v43_v61 = vld [vmem:[%s2436_s1 + $0x90] sm:$0xff]  ;;  %v77_v62 = vld [vmem:[%s2436_s1 + $0x1a0] sm:$0xff]  ;;  %177 = vperm.xlu1 %1582, %v163_v60  }
  0x17   :  { %1452 = vmatpush3.xpose.msk.msra.mxu0 %vm185_vm0, %v69_v26 }
  0x18   :  { %1416 = vmatpush3.xpose.msk.msra.mxu1 %vm185_vm0, %v35_v25  ;;  %1453 = vmatprep.subr.msk.mxu0 %vm185_vm0, %v84_v28 }
  0x19   :  { %1417 = vmatprep.subr.msk.mxu1 %vm185_vm0, %v50_v27 }
  0x1b   :  { %1454 = vmatpush3.xpose.msk.msra.mxu0 %vm185_vm0, %v68_v31 }
  0x1c   :  { %1418 = vmatpush3.xpose.msk.msra.mxu1 %vm185_vm0, %v34_v30  ;;  %1455 = vmatprep.subr.msk.mxu0 %vm185_vm0, %v83_v34 }
  0x1d   :  { %1419 = vmatprep.subr.msk.mxu1 %vm185_vm0, %v49_v33 }
  0x1f   :  { %1456 = vmatpush3.xpose.msk.msra.mxu0 %vm185_vm0, %v67_v37 }
  0x20   :  { %1420 = vmatpush3.xpose.msk.msra.mxu1 %vm185_vm0, %v33_v36  ;;  %1457 = vmatprep.subr.msk.mxu0 %vm185_vm0, %v82_v40 }
  0x21   :  { %1421 = vmatprep.subr.msk.mxu1 %vm185_vm0, %v48_v39 }
  0x23   :  { %1458 = vmatpush3.xpose.msk.msra.mxu0 %vm185_vm0, %v66_v43 }
  0x24   :  { %1422 = vmatpush3.xpose.msk.msra.mxu1 %vm185_vm0, %v32_v42  ;;  %1459 = vmatprep.subr.msk.mxu0 %vm185_vm0, %v81_v45 }
  0x25   :  { %1423 = vmatprep.subr.msk.mxu1 %vm185_vm0, %v47_v44 }
  0x27   :  { %1460 = vmatpush3.xpose.msk.msra.mxu0 %vm185_vm0, %v65_v47 }
  0x28   :  { %1424 = vmatpush3.xpose.msk.msra.mxu1 %vm185_vm0, %v31_v46  ;;  %1461 = vmatprep.subr.msk.mxu0 %vm185_vm0, %v80_v49 }
  0x29   :  { %1425 = vmatprep.subr.msk.mxu1 %vm185_vm0, %v46_v48 }
  0x2b   :  { %1462 = vmatpush3.xpose.msk.msra.mxu0 %vm185_vm0, %v64_v51 }
  0x2c   :  { %1426 = vmatpush3.xpose.msk.msra.mxu1 %vm185_vm0, %v30_v50  ;;  %1463 = vmatprep.subr.msk.mxu0 %vm185_vm0, %v79_v53 }
  0x2d   :  { %1427 = vmatprep.subr.msk.mxu1 %vm185_vm0, %v45_v52 }
  0x2f   :  { %1464 = vmatpush3.xpose.msk.msra.mxu0 %vm185_vm0, %v63_v55 }
  0x30   :  { %1428 = vmatpush3.xpose.msk.msra.mxu1 %vm185_vm0, %v29_v54  ;;  %1465 = vmatprep.subr.msk.mxu0 %vm185_vm0, %v78_v57 }
  0x31   :  { %1429 = vmatprep.subr.msk.mxu1 %vm185_vm0, %v44_v56 }
  0x32   :  { %10 = vsyncpa [#allocation3], 0  ;;  %v164_v63 = vld [vmem:[%s2439_s4 + $0x18] sm:$0xff]  ;;  %v27_v1 = vld [vmem:[%s2436_s1 + $0x10] sm:$0xff]  ;;  %vm1203_vm1 = vcmask 1040384   ;;  %vm1205_vm2 = vcmask 1041408  }
  0x33   :  { %1466 = vmatpush3.xpose.msk.msra.mxu0 %vm185_vm0, %v62_v59  ;;  %v61_v2 = vld [vmem:[%s2436_s1 + $0x120] sm:$0xff]  ;;  %v42_v4 = vld [vmem:[%s2436_s1 + $0x88] sm:$0xff]  ;;  %v76_v6 = vld [vmem:[%s2436_s1 + $0x198] sm:$0xff]  ;;  %182 = vperm.xlu1 %1582, %v164_v63   ;;  %vm1207_vm3 = vcmask 1042432   ;;  %vm1209_vm4 = vcmask 1043456   ;;  %vm1211_vm5 = vcmask 1044480  }
  0x34   :  { %1430 = vmatpush3.xpose.msk.msra.mxu1 %vm185_vm0, %v28_v58  ;;  %1467 = vmatprep.subr.msk.mxu0 %vm185_vm0, %v77_v62  ;;  %v26_v7 = vld [vmem:[%s2436_s1 + $0x8] sm:$0xff]  ;;  %v60_v9 = vld [vmem:[%s2436_s1 + $0x118] sm:$0xff]  ;;  %v41_v10 = vld [vmem:[%s2436_s1 + $0x80] sm:$0xff]  ;;  %vm1213_vm6 = vcmask 1045504   ;;  %vm1215_vm7 = vcmask 1046528  }
  0x35   :  { %1431 = vmatprep.subr.msk.mxu1 %vm185_vm0, %v43_v61  ;;  %v75_v11 = vld [vmem:[%s2436_s1 + $0x190] sm:$0xff]  ;;  %v25_v12 = vld [vmem:[%s2436_s1] sm:$0xff]  ;;  %v74_v14 = vld [vmem:[%s2436_s1 + $0x188] sm:$0xff] }
  0x36   :  { %v59_v13 = vld [vmem:[%s2436_s1 + $0x110] sm:$0xff]  ;;  %v120_v15 = vld [vmem:[%s2436_s1 + $0x2f8] sm:$0xff]  ;;  %v58_v16 = vld [vmem:[%s2436_s1 + $0x108] sm:$0xff] }
  0x37   :  { %1468 = vmatpush3.xpose.msk.msra.mxu0 %vm185_vm0, %v61_v2  ;;  %v104_v17 = vld [vmem:[%s2436_s1 + $0x278] sm:$0xff]  ;;  %v2029_v18 = vld [vmem:[%s2438_s3 + $0x8] sm:$0xff]  ;;  %v73_v19 = vld [vmem:[%s2436_s1 + $0x180] sm:$0xff] }
  0x38   :  { %1432 = vmatpush3.xpose.msk.msra.mxu1 %vm185_vm0, %v27_v1  ;;  %1469 = vmatprep.subr.msk.mxu0 %vm185_vm0, %v76_v6  ;;  %v119_v20 = vld [vmem:[%s2436_s1 + $0x2f0] sm:$0xff]  ;;  %v57_v21 = vld [vmem:[%s2436_s1 + $0x100] sm:$0xff]  ;;  %v118_v24 = vld [vmem:[%s2436_s1 + $0x2e8] sm:$0xff] }
  0x39   :  { %1433 = vmatprep.subr.msk.mxu1 %vm185_vm0, %v42_v4  ;;  %v103_v22 = vld [vmem:[%s2436_s1 + $0x270] sm:$0xff]  ;;  %v152_v25 = vld [vmem:[%s2436_s1 + $0x3f8] sm:$0xff]  ;;  %v102_v26 = vld [vmem:[%s2436_s1 + $0x268] sm:$0xff] }
  0x3a   :  { %v2054_v23 = vld [vmem:[%s2438_s3 + $0x10] sm:$0xff]  ;;  %v136_v27 = vld [vmem:[%s2436_s1 + $0x378] sm:$0xff]  ;;  %v117_v30 = vld [vmem:[%s2436_s1 + $0x2e0] sm:$0xff] }
  0x3b   :  { %1470 = vmatpush3.xpose.msk.msra.mxu0 %vm185_vm0, %v60_v9  ;;  %v2079_v28 = vld [vmem:[%s2438_s3 + $0x18] sm:$0xff]  ;;  %v151_v31 = vld [vmem:[%s2436_s1 + $0x3f0] sm:$0xff]  ;;  %v101_v32 = vld [vmem:[%s2436_s1 + $0x260] sm:$0xff] }
  0x3c   :  { %1434 = vmatpush3.xpose.msk.msra.mxu1 %vm185_vm0, %v26_v7  ;;  %1471 = vmatprep.subr.msk.mxu0 %vm185_vm0, %v75_v11  ;;  %v135_v33 = vld [vmem:[%s2436_s1 + $0x370] sm:$0xff]  ;;  %v116_v34 = vld [vmem:[%s2436_s1 + $0x2d8] sm:$0xff]  ;;  %v150_v35 = vld [vmem:[%s2436_s1 + $0x3e8] sm:$0xff] }
  0x3d   :  { %1435 = vmatprep.subr.msk.mxu1 %vm185_vm0, %v41_v10  ;;  %v100_v36 = vld [vmem:[%s2436_s1 + $0x258] sm:$0xff]  ;;  %v134_v37 = vld [vmem:[%s2436_s1 + $0x368] sm:$0xff]  ;;  %v115_v38 = vld [vmem:[%s2436_s1 + $0x2d0] sm:$0xff] }
  0x3e   :  { %v149_v39 = vld [vmem:[%s2436_s1 + $0x3e0] sm:$0xff]  ;;  %v99_v40 = vld [vmem:[%s2436_s1 + $0x250] sm:$0xff]  ;;  %v114_v42 = vld [vmem:[%s2436_s1 + $0x2c8] sm:$0xff] }
  0x3f   :  { %1472 = vmatpush3.xpose.msk.msra.mxu0 %vm185_vm0, %v59_v13  ;;  %v133_v41 = vld [vmem:[%s2436_s1 + $0x360] sm:$0xff]  ;;  %v148_v43 = vld [vmem:[%s2436_s1 + $0x3d8] sm:$0xff]  ;;  %v98_v44 = vld [vmem:[%s2436_s1 + $0x248] sm:$0xff] }
  0x40   :  { %1436 = vmatpush3.xpose.msk.msra.mxu1 %vm185_vm0, %v25_v12  ;;  %1473 = vmatprep.subr.msk.mxu0 %vm185_vm0, %v74_v14  ;;  %v132_v45 = vld [vmem:[%s2436_s1 + $0x358] sm:$0xff]  ;;  %v113_v46 = vld [vmem:[%s2436_s1 + $0x2c0] sm:$0xff]  ;;  %v147_v47 = vld [vmem:[%s2436_s1 + $0x3d0] sm:$0xff] }
  0x41   :  { %1485 = vmatprep.subr.msk.mxu1 %vm185_vm0, %v120_v15  ;;  %v97_v48 = vld [vmem:[%s2436_s1 + $0x240] sm:$0xff]  ;;  %v131_v49 = vld [vmem:[%s2436_s1 + $0x350] sm:$0xff]  ;;  %v112_v50 = vld [vmem:[%s2436_s1 + $0x2b8] sm:$0xff] }
  0x42   :  { %v146_v51 = vld [vmem:[%s2436_s1 + $0x3c8] sm:$0xff]  ;;  %v96_v52 = vld [vmem:[%s2436_s1 + $0x238] sm:$0xff]  ;;  %v111_v54 = vld [vmem:[%s2436_s1 + $0x2b0] sm:$0xff] }
  0x43   :  { %1438 = vmatmul.mubr.msk.f32.vlgmr.msra.gmra.mxu1 %vm185_vm0, %v1832_v29  ;;  %1474 = vmatpush3.xpose.msk.msra.mxu0 %vm185_vm0, %v58_v16  ;;  %v130_v53 = vld [vmem:[%s2436_s1 + $0x348] sm:$0xff]  ;;  %v145_v55 = vld [vmem:[%s2436_s1 + $0x3c0] sm:$0xff]  ;;  %v95_v56 = vld [vmem:[%s2436_s1 + $0x230] sm:$0xff] }
  0x44   :  { %1486 = vmatpush3.xpose.msk.msra.mxu1 %vm185_vm0, %v104_v17  ;;  %1439 = vmatprep.mubr.msk.f32.mxu1 %vm185_vm0, %v2029_v18  ;;  %v129_v57 = vld [vmem:[%s2436_s1 + $0x340] sm:$0xff]  ;;  %v110_v58 = vld [vmem:[%s2436_s1 + $0x2a8] sm:$0xff]  ;;  %v144_v59 = vld [vmem:[%s2436_s1 + $0x3b8] sm:$0xff] }
  0x45   :  { %1475 = vmatprep.subr.msk.mxu0 %vm185_vm0, %v73_v19  ;;  %1487 = vmatprep.subr.msk.mxu1 %vm185_vm0, %v119_v20  ;;  %v94_v60 = vld [vmem:[%s2436_s1 + $0x228] sm:$0xff]  ;;  %v128_v61 = vld [vmem:[%s2436_s1 + $0x338] sm:$0xff]  ;;  %v109_v62 = vld [vmem:[%s2436_s1 + $0x2a0] sm:$0xff] }
  0x46   :  { %v143_v63 = vld [vmem:[%s2436_s1 + $0x3b0] sm:$0xff]  ;;  %v93_v1 = vld [vmem:[%s2436_s1 + $0x220] sm:$0xff]  ;;  %v108_v4 = vld [vmem:[%s2436_s1 + $0x298] sm:$0xff] }
  0x47   :  { %1440 = vmatmul.mubr.msk.f32.gmra.mxu1 %vm185_vm0, %v2029_v18  ;;  %1476 = vmatpush3.xpose.msk.msra.mxu0 %vm185_vm0, %v57_v21  ;;  %v127_v2 = vld [vmem:[%s2436_s1 + $0x330] sm:$0xff]  ;;  %v142_v6 = vld [vmem:[%s2436_s1 + $0x3a8] sm:$0xff]  ;;  %v92_v7 = vld [vmem:[%s2436_s1 + $0x218] sm:$0xff] }
  0x48   :  { %1488 = vmatpush3.xpose.msk.msra.mxu1 %vm185_vm0, %v103_v22  ;;  %1441 = vmatprep.mubr.msk.f32.mxu1 %vm185_vm0, %v2054_v23  ;;  %v126_v9 = vld [vmem:[%s2436_s1 + $0x328] sm:$0xff]  ;;  %v107_v10 = vld [vmem:[%s2436_s1 + $0x290] sm:$0xff]  ;;  %v141_v11 = vld [vmem:[%s2436_s1 + $0x3a0] sm:$0xff] }
  0x49   :  { %1489 = vmatprep.subr.msk.mxu1 %vm185_vm0, %v118_v24  ;;  %1525 = vmatprep.subr.msk.mxu0 %vm185_vm0, %v152_v25  ;;  %v91_v12 = vld [vmem:[%s2436_s1 + $0x210] sm:$0xff]  ;;  %v125_v13 = vld [vmem:[%s2436_s1 + $0x320] sm:$0xff]  ;;  %v106_v14 = vld [vmem:[%s2436_s1 + $0x288] sm:$0xff] }
  0x4a   :  { %1478 = vmatmul.mubr.msk.f32.vlgmr.msra.gmra.mxu0 %vm185_vm0, %v1832_v29  ;;  %v140_v15 = vld [vmem:[%s2436_s1 + $0x398] sm:$0xff]  ;;  %v90_v16 = vld [vmem:[%s2436_s1 + $0x208] sm:$0xff]  ;;  %v105_v19 = vld [vmem:[%s2436_s1 + $0x280] sm:$0xff] }
  0x4b   :  { %1442 = vmatmul.mubr.msk.f32.gmra.mxu1 %vm185_vm0, %v2054_v23  ;;  %1526 = vmatpush3.xpose.msk.msra.mxu0 %vm185_vm0, %v136_v27  ;;  %v124_v17 = vld [vmem:[%s2436_s1 + $0x318] sm:$0xff]  ;;  %v139_v20 = vld [vmem:[%s2436_s1 + $0x390] sm:$0xff]  ;;  %v89_v21 = vld [vmem:[%s2436_s1 + $0x200] sm:$0xff] }
  0x4c   :  { %1490 = vmatpush3.xpose.msk.msra.mxu1 %vm185_vm0, %v102_v26  ;;  %1443 = vmatprep.mubr.msk.f32.mxu1 %vm185_vm0, %v2079_v28  ;;  %v123_v22 = vld [vmem:[%s2436_s1 + $0x310] sm:$0xff]  ;;  %v138_v24 = vld [vmem:[%s2436_s1 + $0x388] sm:$0xff]  ;;  %v137_v26 = vld [vmem:[%s2436_s1 + $0x380] sm:$0xff] }
  0x4d   :  { %1479 = vmatprep.mubr.msk.f32.mxu0 %vm185_vm0, %v2029_v18  ;;  %1491 = vmatprep.subr.msk.mxu1 %vm185_vm0, %v117_v30  ;;  %v122_v25 = vld [vmem:[%s2436_s1 + $0x308] sm:$0xff]  ;;  %v121_v27 = vld [vmem:[%s2436_s1 + $0x300] sm:$0xff] }
  0x4e   :  { %1527 = vmatprep.subr.msk.mxu0 %vm185_vm0, %v151_v31  ;;  %1480 = vmatmul.mubr.msk.f32.gmra.mxu0 %vm185_vm0, %v2029_v18 }
  0x4f   :  { %1444 = vmatmul.mubr.msk.f32.gmra.mxu1 %vm185_vm0, %v2079_v28  ;;  %1528 = vmatpush3.xpose.msk.msra.mxu0 %vm185_vm0, %v135_v33 }
  0x50   :  { %1492 = vmatpush3.xpose.msk.msra.mxu1 %vm185_vm0, %v101_v32  ;;  %1481 = vmatprep.mubr.msk.f32.mxu0 %vm185_vm0, %v2054_v23 }
  0x51   :  { %1493 = vmatprep.subr.msk.mxu1 %vm185_vm0, %v116_v34  ;;  %1529 = vmatprep.subr.msk.mxu0 %vm185_vm0, %v150_v35 }
  0x52   :  { %1517 = vmatprep.mubr.msk.f32.mxu1 %vm185_vm0, %v1832_v29  ;;  %1482 = vmatmul.mubr.msk.f32.gmra.mxu0 %vm185_vm0, %v2054_v23 }
  0x53   :  { %1530 = vmatpush3.xpose.msk.msra.mxu0 %vm185_vm0, %v134_v37  ;;  %1483 = vmatprep.mubr.msk.f32.mxu0 %vm185_vm0, %v2079_v28 }
  0x54   :  { %1494 = vmatpush3.xpose.msk.msra.mxu1 %vm185_vm0, %v100_v36  ;;  %1531 = vmatprep.subr.msk.mxu0 %vm185_vm0, %v149_v39 }
  0x55   :  { %1495 = vmatprep.subr.msk.mxu1 %vm185_vm0, %v115_v38 }
  0x56   :  { %1484 = vmatmul.mubr.msk.f32.gmra.mxu0 %vm185_vm0, %v2079_v28 }
  0x57   :  { %1532 = vmatpush3.xpose.msk.msra.mxu0 %vm185_vm0, %v133_v41  ;;  %1557 = vmatprep.mubr.msk.f32.mxu0 %vm185_vm0, %v1832_v29 }
  0x58   :  { %1496 = vmatpush3.xpose.msk.msra.mxu1 %vm185_vm0, %v99_v40  ;;  %1533 = vmatprep.subr.msk.mxu0 %vm185_vm0, %v148_v43 }
  0x59   :  { %1497 = vmatprep.subr.msk.mxu1 %vm185_vm0, %v114_v42 }
  0x5b   :  { %1534 = vmatpush3.xpose.msk.msra.mxu0 %vm185_vm0, %v132_v45 }
  0x5c   :  { %1498 = vmatpush3.xpose.msk.msra.mxu1 %vm185_vm0, %v98_v44  ;;  %1535 = vmatprep.subr.msk.mxu0 %vm185_vm0, %v147_v47 }
  0x5d   :  { %1499 = vmatprep.subr.msk.mxu1 %vm185_vm0, %v113_v46 }
  0x5f   :  { %1536 = vmatpush3.xpose.msk.msra.mxu0 %vm185_vm0, %v131_v49 }
  0x60   :  { %1500 = vmatpush3.xpose.msk.msra.mxu1 %vm185_vm0, %v97_v48  ;;  %1537 = vmatprep.subr.msk.mxu0 %vm185_vm0, %v146_v51 }
  0x61   :  { %1501 = vmatprep.subr.msk.mxu1 %vm185_vm0, %v112_v50 }
  0x63   :  { %1538 = vmatpush3.xpose.msk.msra.mxu0 %vm185_vm0, %v130_v53 }
  0x64   :  { %1502 = vmatpush3.xpose.msk.msra.mxu1 %vm185_vm0, %v96_v52  ;;  %1539 = vmatprep.subr.msk.mxu0 %vm185_vm0, %v145_v55 }
  0x65   :  { %1503 = vmatprep.subr.msk.mxu1 %vm185_vm0, %v111_v54 }
  0x67   :  { %1540 = vmatpush3.xpose.msk.msra.mxu0 %vm185_vm0, %v129_v57 }
  0x68   :  { %1504 = vmatpush3.xpose.msk.msra.mxu1 %vm185_vm0, %v95_v56  ;;  %1541 = vmatprep.subr.msk.mxu0 %vm185_vm0, %v144_v59 }
  0x69   :  { %1505 = vmatprep.subr.msk.mxu1 %vm185_vm0, %v110_v58 }
  0x6b   :  { %1542 = vmatpush3.xpose.msk.msra.mxu0 %vm185_vm0, %v128_v61 }
  0x6c   :  { %1506 = vmatpush3.xpose.msk.msra.mxu1 %vm185_vm0, %v94_v60  ;;  %1543 = vmatprep.subr.msk.mxu0 %vm185_vm0, %v143_v63 }
  0x6d   :  { %1507 = vmatprep.subr.msk.mxu1 %vm185_vm0, %v109_v62 }
  0x6f   :  { %1544 = vmatpush3.xpose.msk.msra.mxu0 %vm185_vm0, %v127_v2 }
  0x70   :  { %1508 = vmatpush3.xpose.msk.msra.mxu1 %vm185_vm0, %v93_v1  ;;  %1545 = vmatprep.subr.msk.mxu0 %vm185_vm0, %v142_v6 }
  0x71   :  { %1509 = vmatprep.subr.msk.mxu1 %vm185_vm0, %v108_v4 }
  0x73   :  { %1546 = vmatpush3.xpose.msk.msra.mxu0 %vm185_vm0, %v126_v9 }
  0x74   :  { %1510 = vmatpush3.xpose.msk.msra.mxu1 %vm185_vm0, %v92_v7  ;;  %1547 = vmatprep.subr.msk.mxu0 %vm185_vm0, %v141_v11 }
  0x75   :  { %1511 = vmatprep.subr.msk.mxu1 %vm185_vm0, %v107_v10 }
  0x77   :  { %1548 = vmatpush3.xpose.msk.msra.mxu0 %vm185_vm0, %v125_v13 }
  0x78   :  { %1512 = vmatpush3.xpose.msk.msra.mxu1 %vm185_vm0, %v91_v12  ;;  %1549 = vmatprep.subr.msk.mxu0 %vm185_vm0, %v140_v15 }
  0x79   :  { %1513 = vmatprep.subr.msk.mxu1 %vm185_vm0, %v106_v14 }
  0x7b   :  { %1550 = vmatpush3.xpose.msk.msra.mxu0 %vm185_vm0, %v124_v17 }
  0x7c   :  { %1514 = vmatpush3.xpose.msk.msra.mxu1 %vm185_vm0, %v90_v16  ;;  %1551 = vmatprep.subr.msk.mxu0 %vm185_vm0, %v139_v20 }
  0x7d   :  { %1515 = vmatprep.subr.msk.mxu1 %vm185_vm0, %v105_v19 }
  0x7f   :  { %1552 = vmatpush3.xpose.msk.msra.mxu0 %vm185_vm0, %v123_v22 }
  0x80   :  { %1516 = vmatpush3.xpose.msk.msra.mxu1 %vm185_vm0, %v89_v21  ;;  %1553 = vmatprep.subr.msk.mxu0 %vm185_vm0, %v138_v24 }
  0x83   :  { %1518 = vmatmul.mubr.msk.f32.vlgmr.msra.gmra.mxu1 %vm185_vm0, %v1832_v29  ;;  %1554 = vmatpush3.xpose.msk.msra.mxu0 %vm185_vm0, %v122_v25 }
  0x84   :  { %1519 = vmatprep.mubr.msk.f32.mxu1 %vm185_vm0, %v2029_v18  ;;  %1555 = vmatprep.subr.msk.mxu0 %vm185_vm0, %v137_v26 }
  0x87   :  { %1520 = vmatmul.mubr.msk.f32.gmra.mxu1 %vm185_vm0, %v2029_v18  ;;  %1556 = vmatpush3.xpose.msk.msra.mxu0 %vm185_vm0, %v121_v27 }
  0x88   :  { %1521 = vmatprep.mubr.msk.f32.mxu1 %vm185_vm0, %v2054_v23 }
  0x89   :  { %v168_v38 = vpop.permute.xlu0 %167 }
  0x8a   :  { %1558 = vmatmul.mubr.msk.f32.vlgmr.msra.gmra.mxu0 %vm185_vm0, %v1832_v29 }
  0x8b   :  { %1522 = vmatmul.mubr.msk.f32.gmra.mxu1 %vm185_vm0, %v2054_v23  ;;  %1559 = vmatprep.mubr.msk.f32.mxu0 %vm185_vm0, %v2029_v18 }
  0x8c   :  { %1523 = vmatprep.mubr.msk.f32.mxu1 %vm185_vm0, %v2079_v28 }
  0x8e   :  { %1560 = vmatmul.mubr.msk.f32.gmra.mxu0 %vm185_vm0, %v2029_v18 }
  0x8f   :  { %1524 = vmatmul.mubr.msk.f32.gmra.mxu1 %vm185_vm0, %v2079_v28  ;;  %1561 = vmatprep.mubr.msk.f32.mxu0 %vm185_vm0, %v2054_v23 }
  0x90   :  { %v178_v43 = vpop.permute.xlu1 %177 }
  0x92   :  { %1562 = vmatmul.mubr.msk.f32.gmra.mxu0 %vm185_vm0, %v2054_v23  ;;  %v173_v23 = vpop.permute.xlu0 %172 }
  0x93   :  { %1563 = vmatprep.mubr.msk.f32.mxu0 %vm185_vm0, %v2079_v28 }
  0x96   :  { %1564 = vmatmul.mubr.msk.f32.gmra.mxu0 %vm185_vm0, %v2079_v28 }
  0xae   :  { %v183_v52 = vpop.permute.xlu1 %182 }
  0xca   :  { %v1575_v29 = vpop.f32.mrf.mxu0 }
  0xcb   :  { %v2361_v28 = vadd.f32 %v1575_v29, %v173_v23 }
  0xcc   :  { %v264_v30 = vpop.f32.mrf.mxu0 }
  0xcd   :  { %v2359_v42 = vadd.f32 %v264_v30, %v168_v38 }
  0xce   :  { %v1578_v31 = vpop.f32.mrf.mxu0 }
  0xcf   :  { %v2372_v58 = vadd.f32 %v1578_v31, %v183_v52 }
  0xd0   :  { %v274_v33 = vpop.f32.mrf.mxu0 }
  0xd1   :  { %v2364_v46 = vadd.f32 %v274_v33, %v178_v43 }
 0x103   :  { %v745_v32 = vpop.f32.mrf.mxu1 }
 0x104   :  { %v1035_v45 = vadd.f32 %v745_v32, %v2359_v42 }
 0x105   :  { %v747_v34 = vpop.f32.mrf.mxu1 }
 0x106   :  { %v1056_v47 = vadd.f32 %v747_v34, %v2359_v42  ;;  %1583 = vtanh.f32 %v1035_v45 }
 0x107   :  { %v751_v18 = vpop.f32.mrf.mxu1 }
 0x108   :  { %v1036_v49 = vadd.f32 %v751_v18, %v2361_v28  ;;  %1585 = vtanh.f32 %v1056_v47 }
 0x109   :  { %v753_v37 = vpop.f32.mrf.mxu1 }
 0x10a   :  { %v834_v35 = vpop.f32.mrf.mxu0  ;;  %v1057_v51 = vadd.f32 %v753_v37, %v2361_v28  ;;  %1587 = vtanh.f32 %v1036_v49 }
 0x10b   :  { %v757_v40 = vpop.f32.mrf.mxu1  ;;  %v1077_v54 = vadd.f32 %v834_v35, %v2359_v42 }
 0x10c   :  { %v836_v36 = vpop.f32.mrf.mxu0  ;;  %v1037_v53 = vadd.f32 %v757_v40, %v2364_v46  ;;  %1589 = vtanh.f32 %v1057_v51 }
 0x10d   :  { %v759_v44 = vpop.f32.mrf.mxu1  ;;  %v1098_v59 = vadd.f32 %v836_v36, %v2359_v42 }
 0x10e   :  { %v840_v39 = vpop.f32.mrf.mxu0  ;;  %v1058_v56 = vadd.f32 %v759_v44, %v2364_v46  ;;  %1591 = vtanh.f32 %v1037_v53 }
 0x10f   :  { %v763_v50 = vpop.f32.mrf.mxu1  ;;  %v1078_v60 = vadd.f32 %v840_v39, %v2361_v28  ;;  %1593 = vtanh.f32 %v1077_v54 }
 0x110   :  { %v842_v41 = vpop.f32.mrf.mxu0  ;;  %1595 = vtanh.f32 %v1058_v56  ;;  %v1038_v4 = vadd.f32 %v763_v50, %v2372_v58 }
 0x111   :  { %v765_v57 = vpop.f32.mrf.mxu1  ;;  %1597 = vtanh.f32 %v1098_v59  ;;  %v1099_v1 = vadd.f32 %v842_v41, %v2361_v28 }
 0x112   :  { %v846_v48 = vpop.f32.mrf.mxu0  ;;  %v1059_v61 = vadd.f32 %v765_v57, %v2372_v58  ;;  %1599 = vtanh.f32 %v1078_v60 }
 0x113   :  { %v1079_v63 = vadd.f32 %v846_v48, %v2364_v46  ;;  %v1584_v10 = vpop.eup %1583 }
 0x114   :  { %v848_v55 = vpop.f32.mrf.mxu0  ;;  %1601 = vtanh.f32 %v1059_v61  ;;  %v1043_v27 = vmul.f32 %v1584_v10, %v1747_v8 }
 0x115   :  { %1603 = vtanh.f32 %v1079_v63  ;;  %v1100_v7 = vadd.f32 %v848_v55, %v2364_v46  ;;  %v1586_v11 = vpop.eup %1585 }
 0x116   :  { %v852_v62 = vpop.f32.mrf.mxu0  ;;  %1605 = vtanh.f32 %v1099_v1  ;;  %v1064_v31 = vmul.f32 %v1586_v11, %v1747_v8 }
 0x117   :  { %v1080_v2 = vadd.f32 %v852_v62, %v2372_v58  ;;  %v1588_v12 = vpop.eup %1587 }
 0x118   :  { %v854_v6 = vpop.f32.mrf.mxu0  ;;  %v1044_v20 = vmul.f32 %v1588_v12, %v1733_v5 }
 0x119   :  { %1607 = vtanh.f32 %v1080_v2  ;;  %v1101_v9 = vadd.f32 %v854_v6, %v2372_v58  ;;  %v1590_v13 = vpop.eup %1589 }
 0x11a   :  { %1609 = vtanh.f32 %v1038_v4  ;;  %v1065_v22 = vmul.f32 %v1590_v13, %v1733_v5  ;;  %v1047_v18 = vadd.f32 %v1044_v20, %v1043_v27 }
 0x11b   :  { %1611 = vtanh.f32 %v1100_v7  ;;  %v1592_v15 = vpop.eup %1591 }
 0x11c   :  { %1613 = vtanh.f32 %v1101_v9  ;;  %v1594_v16 = vpop.eup %1593  ;;  %v1045_v32 = vmul.f32 %v1592_v15, %v1723_v3  ;;  %v1068_v38 = vadd.f32 %v1065_v22, %v1064_v31 }
 0x11d   :  { %v1596_v19 = vpop.eup %1595  ;;  %v1085_v39 = vmul.f32 %v1594_v16, %v1747_v8 }
 0x11e   :  { %v1598_v21 = vpop.eup %1597  ;;  %v1066_v44 = vmul.f32 %v1596_v19, %v1723_v3  ;;  %v1048_v49 = vadd.f32 %v1047_v18, %v1045_v32 }
 0x11f   :  { %v1600_v26 = vpop.eup %1599  ;;  %v1106_v50 = vmul.f32 %v1598_v21, %v1747_v8 }
 0x120   :  { %v1086_v40 = vmul.f32 %v1600_v26, %v1733_v5  ;;  %v1069_v2 = vadd.f32 %v1068_v38, %v1066_v44 }
 0x121   :  { %v1602_v30 = vpop.eup %1601 }
 0x122   :  { %v1604_v35 = vpop.eup %1603  ;;  %v1067_v55 = vmul.f32 %v1602_v30, %v1710_v0  ;;  %v1089_v59 = vadd.f32 %v1086_v40, %v1085_v39 }
 0x123   :  { %v1606_v37 = vpop.eup %1605  ;;  %v1087_v51 = vmul.f32 %v1604_v35, %v1723_v3 }
 0x124   :  { %v1107_v60 = vmul.f32 %v1606_v37, %v1733_v5  ;;  %v1070_v12 = vadd.f32 %v1069_v2, %v1067_v55 }
 0x125   :  { %v1090_v9 = vadd.f32 %v1089_v59, %v1087_v51 }
 0x126   :  { %v1608_v43 = vpop.eup %1607  ;;  %v1110_v15 = vadd.f32 %v1107_v60, %v1106_v50  ;;  %v1071_v27 = vrot.slane %v1070_v12, 4 }
 0x127   :  { %v1610_v48 = vpop.eup %1609  ;;  %v1088_v61 = vmul.f32 %v1608_v43, %v1710_v0 }
 0x128   :  { %v1612_v54 = vpop.eup %1611  ;;  %v1046_v7 = vmul.f32 %v1610_v48, %v1710_v0 }
 0x129   :  { %v1614_v1 = vpop.eup %1613  ;;  %v1091_v16 = vadd.f32 %v1090_v9, %v1088_v61 }
 0x12a   :  { %v1049_v21 = vadd.f32 %v1048_v49, %v1046_v7 }
 0x143   :  { %v923_v14 = vpop.f32.mrf.mxu1 }
 0x144   :  { %v1119_v24 = vadd.f32 %v923_v14, %v2359_v42 }
 0x145   :  { %v925_v17 = vpop.f32.mrf.mxu1 }
 0x146   :  { %v1140_v33 = vadd.f32 %v925_v17, %v2359_v42  ;;  %v1109_v17 = vmul.f32 %v1614_v1, %v1710_v0 }
 0x147   :  { %v929_v25 = vpop.f32.mrf.mxu1 }
 0x148   :  { %v1120_v29 = vadd.f32 %v929_v25, %v2361_v28 }
 0x149   :  { %v931_v34 = vpop.f32.mrf.mxu1 }
 0x14a   :  { %1615 = vtanh.f32 %v1120_v29  ;;  %v1141_v36 = vadd.f32 %v931_v34, %v2361_v28  ;;  %v1012_v41 = vpop.f32.mrf.mxu0  ;;  %v1092_v29 = vrot.slane %v1091_v16, 4  ;;  %v1050_v34 = vrot.slane %v1049_v21, 4 }
 0x14b   :  { %1617 = vtanh.f32 %v1119_v24  ;;  %v935_v23 = vpop.f32.mrf.mxu1  ;;  %v1161_v47 = vadd.f32 %v1012_v41, %v2359_v42 }
 0x14c   :  { %1619 = vtanh.f32 %v1141_v36  ;;  %v1121_v45 = vadd.f32 %v935_v23, %v2364_v46  ;;  %v1014_v53 = vpop.f32.mrf.mxu0  ;;  %v1093_v39 = vadd.f32 %v1092_v29, %v1091_v16 }
 0x14d   :  { %1621 = vtanh.f32 %v1140_v33  ;;  %v937_v52 = vpop.f32.mrf.mxu1  ;;  %v1182_v57 = vadd.f32 %v1014_v53, %v2359_v42  ;;  %v1108_v42 = vmul.f32 %v1612_v54, %v1723_v3 }
 0x14e   :  { %1623 = vtanh.f32 %v1121_v45  ;;  %v1142_v56 = vadd.f32 %v937_v52, %v2364_v46  ;;  %v1018_v63 = vpop.f32.mrf.mxu0  ;;  %v1094_v53 = vrot.slane %v1093_v39, 2 }
 0x14f   :  { %1625 = vtanh.f32 %v1161_v47  ;;  %v941_v62 = vpop.f32.mrf.mxu1  ;;  %v1162_v6 = vadd.f32 %v1018_v63, %v2361_v28  ;;  %v1111_v22 = vadd.f32 %v1110_v15, %v1108_v42  ;;  %v1051_v47 = vadd.f32 %v1050_v34, %v1049_v21 }
 0x150   :  { %1627 = vtanh.f32 %v1142_v56  ;;  %v1122_v4 = vadd.f32 %v941_v62, %v2372_v58  ;;  %v1020_v11 = vpop.f32.mrf.mxu0  ;;  %v1095_v9 = vadd.f32 %v1094_v53, %v1093_v39 }
 0x151   :  { %1629 = vtanh.f32 %v1182_v57  ;;  %v943_v10 = vpop.f32.mrf.mxu1  ;;  %v1183_v14 = vadd.f32 %v1020_v11, %v2361_v28  ;;  %v1112_v28 = vadd.f32 %v1111_v22, %v1109_v17  ;;  %v1052_v61 = vrot.slane %v1051_v47, 2 }
 0x152   :  { %1631 = vtanh.f32 %v1122_v4  ;;  %v1143_v13 = vadd.f32 %v943_v10, %v2372_v58  ;;  %v1024_v19 = vpop.f32.mrf.mxu0 }
 0x153   :  { %1633 = vtanh.f32 %v1162_v6  ;;  %v1163_v20 = vadd.f32 %v1024_v19, %v2364_v46  ;;  %v1113_v40 = vrot.slane %v1112_v28, 4  ;;  %v1053_v16 = vadd.f32 %v1052_v61, %v1051_v47 }
 0x154   :  { %1635 = vtanh.f32 %v1143_v13  ;;  %v1026_v24 = vpop.f32.mrf.mxu0  ;;  %v1652_v13 = vld [vmem:[%s2435_s0 + $0x10] sm:$0xff] }
 0x155   :  { %1637 = vtanh.f32 %v1183_v14  ;;  %v1184_v25 = vadd.f32 %v1026_v24, %v2364_v46  ;;  %v1072_v46 = vadd.f32 %v1071_v27, %v1070_v12  ;;  %v1114_v54 = vadd.f32 %v1113_v40, %v1112_v28 }
 0x156   :  { %1639 = vtanh.f32 %v1163_v20  ;;  %v1030_v30 = vpop.f32.mrf.mxu0 }
 0x157   :  { %v1616_v26 = vpop.eup %1615  ;;  %1641 = vtanh.f32 %v1184_v25  ;;  %v1164_v32 = vadd.f32 %v1030_v30, %v2372_v58  ;;  %v1073_v52 = vrot.slane %v1072_v46, 2  ;;  %v1115_v42 = vrot.slane %v1114_v54, 2 }
 0x158   :  { %v1618_v31 = vpop.eup %1617  ;;  %v1032_v35 = vpop.f32.mrf.mxu0  ;;  %v1128_v36 = vmul.f32 %v1616_v26, %v1733_v5 }
 0x159   :  { %v1620_v33 = vpop.eup %1619  ;;  %1643 = vtanh.f32 %v1164_v32  ;;  %v1185_v37 = vadd.f32 %v1032_v35, %v2372_v58  ;;  %v1127_v41 = vmul.f32 %v1618_v31, %v1747_v8  ;;  %v1074_v7 = vadd.f32 %v1073_v52, %v1072_v46 }
 0x15a   :  { %v1622_v18 = vpop.eup %1621  ;;  %v1149_v43 = vmul.f32 %v1620_v33, %v1733_v5  ;;  %v1116_v26 = vadd.f32 %v1115_v42, %v1114_v54  ;;  %v1054_v33 = vrot.slane %v1053_v16, 1 }
 0x15b   :  { %v1624_v38 = vpop.eup %1623  ;;  %1645 = vtanh.f32 %v1185_v37  ;;  %v1148_v49 = vmul.f32 %v1622_v18, %v1747_v8  ;;  %v1131_v50 = vadd.f32 %v1128_v36, %v1127_v41  ;;  %v1075_v25 = vrot.slane %v1074_v7, 1 }
 0x15c   :  { %v1626_v23 = vpop.eup %1625  ;;  %v1129_v44 = vmul.f32 %v1624_v38, %v1723_v3  ;;  %v1117_v46 = vrot.slane %v1116_v26, 1 }
 0x15d   :  { %v1628_v45 = vpop.eup %1627  ;;  %v1152_v56 = vadd.f32 %v1149_v43, %v1148_v49  ;;  %v1076_v37 = vadd.f32 %v1075_v25, %v1074_v7  ;;  %v1055_v43 = vadd.f32 %v1054_v33, %v1053_v16 }
 0x15e   :  { %v1630_v48 = vpop.eup %1629  ;;  %v1150_v58 = vmul.f32 %v1628_v45, %v1723_v3  ;;  %v1132_v57 = vadd.f32 %v1131_v50, %v1129_v44  ;;  %v1651_v3 = vld [vmem:[%s2435_s0 + $0x18] sm:$0xff]  ;;  %s1676_s0 = smov [#allocation2]  }
 0x15f   :  { %v1632_v51 = vpop.eup %1631  ;;  %v1190_v17 = vmul.f32 %v1630_v48, %v1747_v8  ;;  %v1204_v47 = vsel %vm1203_vm1, %v1055_v43, %v1076_v37  ;;  %v1118_v48 = vadd.f32 %v1117_v46, %v1116_v26  ;;  %s1241_s16 = sshll.u32 %s1676_s0, 4  ;;  %s1242_s16 = int_to_ptr.vmem [resolvable:$true] %s1241_s16 }
 0x160   :  { %v1634_v55 = vpop.eup %1633  ;;  %v1130_v59 = vmul.f32 %v1632_v51, %v1710_v0  ;;  %v1153_v63 = vadd.f32 %v1152_v56, %v1150_v58  ;;  %v1169_v0 = vmul.f32 %v1626_v23, %v1747_v8  ;;  %s1653_s3 = scalar_lea.vmem %s1242_s16, 128  ;;  %p1658_p1 = scmp.lt.s32.totalorder %s1242_s16, %s1242_s16 }
 0x161   :  { %v1636_v60 = vpop.eup %1635  ;;  %v1170_v2 = vmul.f32 %v1634_v55, %v1733_v5  ;;  %p1654_p0 = scmp.ne.s32.totalorder %s1242_s16, %s1653_s3  ;;  %p1659_p2 = scmp.lt.s32.totalorder %s1653_s3, %s1653_s3 }
 0x162   :  { %v1638_v62 = vpop.eup %1637  ;;  %v1133_v1 = vadd.f32 %v1132_v57, %v1130_v59  ;;  %v1151_v4 = vmul.f32 %v1651_v3, %v1636_v60 }
 0x163   :  { %v1640_v6 = vpop.eup %1639  ;;  %v1191_v10 = vmul.f32 %v1638_v62, %v1733_v5  ;;  %v1173_v20 = vadd.f32 %v1170_v2, %v1169_v0  ;;  %v1096_v5 = vrot.slane %v1095_v9, 1  ;;  %p1660_p3 = por %p1659_p2, %p1658_p1 }
 0x164   :  { %v1134_v11 = vrot.slane %v1133_v1, 4  ;;  %v1154_v12 = vadd.f32 %v1153_v63, %v1151_v4  ;;  %v1171_v14 = vmul.f32 %v1652_v13, %v1640_v6  ;;  %v1642_v15 = vpop.eup %1641 }
 0x165   :  { %v1192_v22 = vmul.f32 %v1652_v13, %v1642_v15  ;;  %v1194_v27 = vadd.f32 %v1191_v10, %v1190_v17  ;;  %v1097_v38 = vadd.f32 %v1096_v5, %v1095_v9  ;;  %p1661_p4 = pnand %p1660_p3, %p1654_p0 }
 0x166   :  { %v1135_v19 = vadd.f32 %v1134_v11, %v1133_v1  ;;  %v1155_v21 = vrot.slane %v1154_v12, 4  ;;  %v1644_v24 = vpop.eup %1643  ;;  %v1174_v30 = vadd.f32 %v1173_v20, %v1171_v14 }
 0x167   :  { %v1172_v31 = vmul.f32 %v1651_v3, %v1644_v24  ;;  %v1195_v34 = vadd.f32 %v1194_v27, %v1192_v22  ;;  %v1206_v50 = vsel %vm1205_vm2, %v1204_v47, %v1097_v38 }
 0x168   :  { %v1136_v29 = vrot.slane %v1135_v19, 2  ;;  %v1156_v28 = vadd.f32 %v1155_v21, %v1154_v12  ;;  %v1646_v32 = vpop.eup %1645  ;;  %v1208_v55 = vsel %vm1207_vm3, %v1206_v50, %v1118_v48 }
 0x169   :  { %v1175_v36 = vadd.f32 %v1174_v30, %v1172_v31  ;;  %v1193_v8 = vmul.f32 %v1651_v3, %v1646_v32 }
 0x16a   :  { %v1137_v35 = vadd.f32 %v1136_v29, %v1135_v19  ;;  %v1157_v18 = vrot.slane %v1156_v28, 2 }
 0x16b   :  { %v1176_v23 = vrot.slane %v1175_v36, 4  ;;  %v1196_v41 = vadd.f32 %v1195_v34, %v1193_v8 }
 0x16c   :  { %v1138_v39 = vrot.slane %v1137_v35, 1  ;;  %v1158_v40 = vadd.f32 %v1157_v18, %v1156_v28 }
 0x16d   :  { %v1177_v44 = vadd.f32 %v1176_v23, %v1175_v36  ;;  %v1197_v45 = vrot.slane %v1196_v41, 4 }
 0x16e   :  { %v1159_v49 = vrot.slane %v1158_v40, 1  ;;  %v1139_v58 = vadd.f32 %v1138_v39, %v1137_v35 }
 0x16f   :  { %v1178_v51 = vrot.slane %v1177_v44, 2  ;;  %v1198_v52 = vadd.f32 %v1197_v45, %v1196_v41 }
 0x170   :  { %v1160_v56 = vadd.f32 %v1159_v49, %v1158_v40  ;;  %v1210_v57 = vsel %vm1209_vm4, %v1208_v55, %v1139_v58 }
 0x171   :  { %v1179_v53 = vadd.f32 %v1178_v51, %v1177_v44  ;;  %v1199_v54 = vrot.slane %v1198_v52, 2 }
 0x172   :  { %v1212_v63 = vsel %vm1211_vm5, %v1210_v57, %v1160_v56 }
 0x173   :  { %v1180_v59 = vrot.slane %v1179_v53, 1  ;;  %v1200_v60 = vadd.f32 %v1199_v54, %v1198_v52 }
 0x175   :  { %v1181_v61 = vadd.f32 %v1180_v59, %v1179_v53  ;;  %v1201_v62 = vrot.slane %v1200_v60, 1 }
 0x177   :  { %v1214_v1 = vsel %vm1213_vm6, %v1212_v63, %v1181_v61  ;;  %v1202_v2 = vadd.f32 %v1201_v62, %v1200_v60 }
 0x179   :  { %v1216_v3 = vsel %vm1215_vm7, %v1214_v1, %v1202_v2 }
 0x17a   :  { %v1217_v4 = vrot.slane %v1216_v3, 4 }
 0x17c   :  { %v1218_v6 = vmax.f32 %v1216_v3, %v1217_v4 }
 0x17e   :  { %v1219_v7 = vrot.slane %v1218_v6, 2 }
 0x180   :  { %v1220_v9 = vmax.f32 %v1218_v6, %v1219_v7 }
 0x182   :  { %v1221_v42 = vrot.slane %v1220_v9, 1 }
 0x184   :  { %v1222_v10 = vmax.f32 %v1220_v9, %v1221_v42 }
 0x186   :  { %v1223_v0 = vsub.f32 %v1216_v3, %v1222_v10 }
 0x188   :  { %v1224_v11 = vmul.f32 1.442695, %v1223_v0 }
 0x18a   :  { %1647 = vpow2.f32 %v1224_v11 }
 0x197   :  { %v1648_v12 = vpop.eup %1647 }
 0x198   :  { %v1226_v13 = vrot.slane %v1648_v12, 4 }
 0x19a   :  { %v1227_v14 = vadd.f32 %v1648_v12, %v1226_v13 }
 0x19c   :  { %v1228_v15 = vrot.slane %v1227_v14, 2 }
 0x19e   :  { %v1229_v16 = vadd.f32 %v1228_v15, %v1227_v14 }
 0x1a0   :  { %v1230_v17 = vrot.slane %v1229_v16, 1 }
 0x1a2   :  { %v1231_v19 = vadd.f32 %v1230_v17, %v1229_v16 }
 0x1a4   :  { %1649 = vrcp.f32 %v1231_v19 }
 0x1b1   :  { %v1650_v20 = vpop.eup %1649 }
 0x1b2   :  { %v1233_v21 = vmul.f32 %v1650_v20, %v1648_v12 }
 0x1b4   :  { %1234 = vst [vmem:[#allocation2] sm:$0xff] %v1233_v21 }
 0x1b5   :  { %1664 = shalt.err (!%p1661_p4)
}
 0x1b6   :  { %1244 = dma.vmem_to_hbm [thread:$0]  %s1242_s16, 128, %s2440_s5, [#allocation3]  }
 0x1b7   :  { %1673 = dma.done.wait [#allocation3], 128  }
 0x1b8   :  { %1674 = vsyncadd [#allocation3], 4294967168 }
 0x1b9   :  { %1248 = vsyncpa [#allocation3], 1 }

</bundles_post_ra>
